<compile_context>
chip_gen: v7x
topology: tpu7x:2x2x1
jax: 0.10.0
libtpu: 0.0.40
codegen_flags: <defaults>
</compile_context>

<pallas_src>
import functools

import jax
import jax.numpy as jnp
import numpy as np
from jax.experimental import pallas as pl
from jax.experimental.pallas import tpu as pltpu


def _round_up(n, m):
    return ((n + m - 1) // m) * m


def _pad2(a, rows, cols):
    r, c = a.shape
    return jnp.pad(a, ((0, rows - r), (0, cols - c)))


# ----------------------------------------------------------------------------
# Single fused kernel:
#   RNN encoder + masked max-pool + FC  ->  logits
#   + weighted cross-entropy + L2 regularizer + argmax   (epilogue)
# ----------------------------------------------------------------------------
def _f2sa_forward_kernel(x2d_ref, lens_ref, labels_ref, lamb_ref,
                         w_ih_ref, w_hh_ref, b_h_ref, w_fc_ref, b_fc_ref,
                         params_ref,
                         logits_ref, loss_ref, preds_ref,
                         *, T, B, C):
    Hp = w_hh_ref.shape[0]
    Cp = w_fc_ref.shape[1]

    # Hoisted input projection: one (T*B, D) x (D, Hp) MXU matmul, off the
    # serial recurrence chain.
    xw = (jnp.dot(x2d_ref[...], w_ih_ref[...],
                  preferred_element_type=jnp.float32)
          + b_h_ref[...])                                   # (T*B, Hp)

    lens = lens_ref[...]                                    # (B, 1) int32
    w_hh = w_hh_ref[...]                                    # (Hp, Hp)

    h = jnp.zeros((B, Hp), jnp.float32)
    pool = jnp.full((B, Hp), -jnp.inf, jnp.float32)

    # T is static & small -> fully unrolled serial recurrence.  Slices of xw
    # are at sublane-tile boundaries (B == 8 rows), so they are free views.
    for t in range(T):
        xw_t = xw[t * B:(t + 1) * B, :]                     # (B, Hp)
        h_new = jnp.tanh(
            xw_t + jnp.dot(h, w_hh, preferred_element_type=jnp.float32))
        valid = lens > t                                    # (B, 1) bool
        h = jnp.where(valid, h_new, h)
        pool = jnp.where(valid, jnp.maximum(pool, h_new), pool)

    # Guard: a sample with lens == 0 would keep its pooled row at -inf.
    pool = jnp.where(lens > 0, pool, 0.0)

    logits = (jnp.dot(pool, w_fc_ref[...],
                      preferred_element_type=jnp.float32)
              + b_fc_ref[...])                              # (B, Cp)
    logits_ref[...] = logits                                # lane-dense store

    # ---------------- fused loss / preds epilogue ----------------
    col = jax.lax.broadcasted_iota(jnp.int32, (B, Cp), 1)
    cmask = col < C                                         # valid class cols
    neg = jnp.float32(-1e30)
    lm = jnp.where(cmask, logits, neg)                      # mask padded cols

    m = jnp.max(lm, axis=-1, keepdims=True)
    lse = jnp.log(jnp.sum(jnp.exp(lm - m), axis=-1, keepdims=True)) + m
    onehot = (col == labels_ref[...]).astype(jnp.float32)
    picked = jnp.sum(logits * onehot, axis=-1, keepdims=True)
    ce = lse - picked                                       # (B, 1) per-sample

    wgt = jax.nn.sigmoid(lamb_ref[...])                     # (B, 1)
    reg = 1e-4 * jnp.sqrt(jnp.sum(params_ref[...] * params_ref[...]))
    loss_ref[0, 0] = jnp.sum(wgt * ce) / B + reg

    # argmax over valid classes (first max index, like torch.argmax)
    is_max = (lm == m) & cmask
    idx = jnp.where(is_max, col, Cp)
    pred = jnp.min(idx, axis=-1, keepdims=True)             # (B, 1) int32
    preds_ref[...] = jnp.broadcast_to(pred, (B, Cp))        # lane-dense store


def f2sa_forward(x, lens, labels, lamb_vals,
                 w_ih, w_hh, b_h, w_fc, b_fc, params_flat):
    """x: (T,B,D) f32, lens/labels: (B,1) i32, lamb_vals: (B,1) f32,
    params_flat: (R,128) f32 (zero padded flat params for the regularizer).
    Returns (logits (B,C) f32, loss scalar f32, preds (B,) i32)."""
    T, B, D = x.shape
    H = w_hh.shape[0]
    C = w_fc.shape[1]
    Hp = _round_up(H, 128)   # lane / MXU friendly hidden width
    Cp = _round_up(C, 128)   # lane-dense class width

    # Zero-padding keeps the math exact: padded hidden units stay exactly 0
    # through the recurrence, padded class columns produce 0 logits that are
    # masked out of the CE / argmax in-kernel.
    w_ih_p = _pad2(w_ih, D, Hp)
    w_hh_p = _pad2(w_hh, Hp, Hp)
    b_h_p = _pad2(b_h, 1, Hp)
    w_fc_p = _pad2(w_fc, Hp, Cp)
    b_fc_p = _pad2(b_fc, 1, Cp)

    x2d = x.reshape(T * B, D)   # host-side reshape (free), hoisted projection

    kernel = functools.partial(_f2sa_forward_kernel, T=T, B=B, C=C)
    vmem = pl.BlockSpec(memory_space=pltpu.MemorySpace.VMEM)

    logits_p, loss, preds_p = pl.pallas_call(
        kernel,
        out_shape=(jax.ShapeDtypeStruct((B, Cp), jnp.float32),
                   jax.ShapeDtypeStruct((1, 1), jnp.float32),
                   jax.ShapeDtypeStruct((B, Cp), jnp.int32)),
        in_specs=[vmem] * 10,
        out_specs=(pl.BlockSpec(memory_space=pltpu.MemorySpace.VMEM),
                   pl.BlockSpec(memory_space=pltpu.MemorySpace.SMEM),
                   pl.BlockSpec(memory_space=pltpu.MemorySpace.VMEM)),
    )(x2d, lens, labels, lamb_vals,
      w_ih_p, w_hh_p, b_h_p, w_fc_p, b_fc_p, params_flat)

    return logits_p[:, :C], loss[0, 0], preds_p[:, 0]


# ----------------------------------------------------------------------------
# Pure-JAX reference for correctness checking
# ----------------------------------------------------------------------------
def _ref_logits(x, lens, w_ih, w_hh, b_h, w_fc, b_fc):
    T, B, D = x.shape
    H = w_hh.shape[0]
    h = jnp.zeros((B, H), jnp.float32)
    pool = jnp.full((B, H), -jnp.inf, jnp.float32)
    for t in range(T):
        valid = lens[:, :1] > t
        h_new = jnp.tanh(x[t] @ w_ih + h @ w_hh + b_h)
        h = jnp.where(valid, h_new, h)
        pool = jnp.where(valid, jnp.maximum(pool, h_new), pool)
    pool = jnp.where(lens[:, :1] > 0, pool, 0.0)
    return pool @ w_fc + b_fc


def _ref_loss(logits, labels, lamb_vals, params_flat):
    logp = jax.nn.log_softmax(logits, axis=-1)
    ce = -jnp.take_along_axis(logp, labels, axis=-1)
    loss = jnp.mean(jax.nn.sigmoid(lamb_vals) * ce) \
        + 1e-4 * jnp.sqrt(jnp.sum(params_flat ** 2))
    preds = jnp.argmax(logits, axis=-1).astype(jnp.int32)
    return loss, preds


# TODO(synk): the SGD/autograd/LR-scheduler/DataLoader bookkeeping of
# Learner.forward (optimizer.step(), torch.autograd.grad, accuracy_score,
# lambda_x updates, etc.) is host-side training-loop logic with no Pallas
# equivalent; only the tensor forward path (predict -> weighted CE + reg +
# softmax/argmax) is implemented here.  The lambda_x[data_indx] gather is
# host-side glue as in the original module.

if __name__ == "__main__":
    # Small shapes consistent with the module's forward:
    # T = max sentence length, B = batch, D = word_embed_dim,
    # H = encoder_dim, C = n_classes, N = training_size (for lambda_x).
    T, B, D, H, C, N = 8, 8, 32, 64, 4, 32

    key = jax.random.PRNGKey(0)
    kx, kl, ky, ki, k1, k2, k3, k4, k5 = jax.random.split(key, 9)

    # inputs as produced by collate_pad_: (T, B, D) zero-padded embeddings
    lens = jax.random.randint(kl, (B,), 1, T + 1).astype(jnp.int32)
    x = jax.random.normal(kx, (T, B, D), jnp.float32)
    time_ix = jnp.arange(T)[:, None, None]
    x = jnp.where(time_ix < lens[None, :, None], x, 0.0)

    labels = jax.random.randint(ky, (B,), 0, C).astype(jnp.int32)
    data_indx = jax.random.randint(ki, (B,), 0, N).astype(jnp.int32)
    lambda_x = jnp.ones((N,), jnp.float32)          # torch.ones(training_size)

    # deterministic RNN + classifier parameters (inner_model_y analogue)
    w_ih = 0.1 * jax.random.normal(k1, (D, H), jnp.float32)
    w_hh = 0.1 * jax.random.normal(k2, (H, H), jnp.float32)
    b_h = 0.1 * jax.random.normal(k3, (1, H), jnp.float32)
    w_fc = 0.1 * jax.random.normal(k4, (H, C), jnp.float32)
    b_fc = 0.1 * jax.random.normal(k5, (1, C), jnp.float32)

    # flatten all (unpadded) params and zero-pad to a (R, 128) slab for the
    # weight-norm regularizer reduction
    flat = jnp.concatenate([p.reshape(-1)
                            for p in (w_ih, w_hh, b_h, w_fc, b_fc)])
    pad = (-flat.shape[0]) % 1024
    params_flat = jnp.pad(flat, (0, pad)).reshape(-1, 128)

    lens2d = lens[:, None]
    labels2d = labels[:, None]
    lamb_vals = lambda_x[data_indx][:, None]        # host-side gather glue

    # ---- fused Pallas forward: predict() + weighted CE + reg + preds ----
    logits, loss, preds = f2sa_forward(x, lens2d, labels2d, lamb_vals,
                                       w_ih, w_hh, b_h, w_fc, b_fc,
                                       params_flat)
    jax.block_until_ready((logits, loss, preds))

    # ---- check against pure-JAX reference ----
    ref_logits = _ref_logits(x, lens2d, w_ih, w_hh, b_h, w_fc, b_fc)
    ref_loss, ref_preds = _ref_loss(ref_logits, labels2d, lamb_vals,
                                    params_flat.reshape(-1))
    np.testing.assert_allclose(np.asarray(logits), np.asarray(ref_logits),
                               rtol=5e-2, atol=5e-2)
    np.testing.assert_allclose(float(loss), float(ref_loss),
                               rtol=5e-2, atol=5e-2)
    assert np.array_equal(np.asarray(preds), np.asarray(ref_preds))

    print("KERNEL_OK")
</pallas_src>

<mosaic_0001>
module attributes {stable_mosaic.version = 11 : i64} {
  func.func @_f2sa_forward_kernel(%arg0: memref<64x32xf32, #tpu.memory_space<vmem>>, %arg1: memref<8x1xi32, #tpu.memory_space<vmem>>, %arg2: memref<8x1xi32, #tpu.memory_space<vmem>>, %arg3: memref<8x1xf32, #tpu.memory_space<vmem>>, %arg4: memref<32x128xf32, #tpu.memory_space<vmem>>, %arg5: memref<128x128xf32, #tpu.memory_space<vmem>>, %arg6: memref<1x128xf32, #tpu.memory_space<vmem>>, %arg7: memref<128x128xf32, #tpu.memory_space<vmem>>, %arg8: memref<1x128xf32, #tpu.memory_space<vmem>>, %arg9: memref<56x128xf32, #tpu.memory_space<vmem>>, %arg10: memref<8x128xf32, #tpu.memory_space<vmem>>, %arg11: memref<1x1xf32, #tpu.memory_space<smem>>, %arg12: memref<8x128xi32, #tpu.memory_space<vmem>>) attributes {dimension_semantics = [], scalar_prefetch = 0 : i64, scratch_operands = 0 : i64, tpu.core_type = #tpu.core_type<tc>} {
    %c0 = arith.constant 0 : index
    %c0_0 = arith.constant 0 : index
    %0 = vector.load %arg0[%c0, %c0_0] : memref<64x32xf32, #tpu.memory_space<vmem>>, vector<64x32xf32>
    %c0_1 = arith.constant 0 : index
    %c0_2 = arith.constant 0 : index
    %1 = vector.load %arg4[%c0_1, %c0_2] : memref<32x128xf32, #tpu.memory_space<vmem>>, vector<32x128xf32>
    %cst = arith.constant dense<0.000000e+00> : vector<64x128xf32>
    %2 = tpu.matmul %0, %1, %cst {dimension_numbers = #tpu.dot_dimension_numbers<[1], [0], [0], [1], [0, 0, 1, 1], [], []>} : vector<64x32xf32>, vector<32x128xf32>, vector<64x128xf32> -> vector<64x128xf32>
    %c0_3 = arith.constant 0 : index
    %c0_4 = arith.constant 0 : index
    %3 = vector.load %arg6[%c0_3, %c0_4] : memref<1x128xf32, #tpu.memory_space<vmem>>, vector<1x128xf32>
    %4 = vector.broadcast %3 : vector<1x128xf32> to vector<64x128xf32>
    %5 = arith.addf %2, %4 : vector<64x128xf32>
    %c0_5 = arith.constant 0 : index
    %c0_6 = arith.constant 0 : index
    %6 = vector.load %arg1[%c0_5, %c0_6] : memref<8x1xi32, #tpu.memory_space<vmem>>, vector<8x1xi32>
    %c0_7 = arith.constant 0 : index
    %c0_8 = arith.constant 0 : index
    %7 = vector.load %arg5[%c0_7, %c0_8] : memref<128x128xf32, #tpu.memory_space<vmem>>, vector<128x128xf32>
    %cst_9 = arith.constant 0.000000e+00 : f32
    %8 = vector.broadcast %cst_9 : f32 to vector<8x128xf32>
    %cst_10 = arith.constant 0xFF800000 : f32
    %9 = vector.broadcast %cst_10 : f32 to vector<8x128xf32>
    %10 = vector.extract_strided_slice %5 {offsets = [0, 0], sizes = [8, 128], strides = [1, 1]} : vector<64x128xf32> to vector<8x128xf32>
    %cst_11 = arith.constant dense<0.000000e+00> : vector<8x128xf32>
    %11 = tpu.matmul %8, %7, %cst_11 {dimension_numbers = #tpu.dot_dimension_numbers<[1], [0], [0], [1], [0, 0, 1, 1], [], []>} : vector<8x128xf32>, vector<128x128xf32>, vector<8x128xf32> -> vector<8x128xf32>
    %12 = arith.addf %10, %11 : vector<8x128xf32>
    %13 = math.tanh %12 : vector<8x128xf32>
    %c0_i32 = arith.constant 0 : i32
    %14 = vector.broadcast %c0_i32 : i32 to vector<8x1xi32>
    %15 = arith.cmpi sgt, %6, %14 : vector<8x1xi32>
    %16 = vector.shape_cast %15 : vector<8x1xi1> to vector<8x1xi1>
    %17 = vector.broadcast %16 : vector<8x1xi1> to vector<8x128xi1>
    %18 = arith.select %17, %13, %8 : vector<8x128xi1>, vector<8x128xf32>
    %19 = arith.maximumf %9, %13 : vector<8x128xf32>
    %20 = vector.shape_cast %15 : vector<8x1xi1> to vector<8x1xi1>
    %21 = vector.broadcast %20 : vector<8x1xi1> to vector<8x128xi1>
    %22 = arith.select %21, %19, %9 : vector<8x128xi1>, vector<8x128xf32>
    %23 = vector.extract_strided_slice %5 {offsets = [8, 0], sizes = [8, 128], strides = [1, 1]} : vector<64x128xf32> to vector<8x128xf32>
    %cst_12 = arith.constant dense<0.000000e+00> : vector<8x128xf32>
    %24 = tpu.matmul %18, %7, %cst_12 {dimension_numbers = #tpu.dot_dimension_numbers<[1], [0], [0], [1], [0, 0, 1, 1], [], []>} : vector<8x128xf32>, vector<128x128xf32>, vector<8x128xf32> -> vector<8x128xf32>
    %25 = arith.addf %23, %24 : vector<8x128xf32>
    %26 = math.tanh %25 : vector<8x128xf32>
    %c1_i32 = arith.constant 1 : i32
    %27 = vector.broadcast %c1_i32 : i32 to vector<8x1xi32>
    %28 = arith.cmpi sgt, %6, %27 : vector<8x1xi32>
    %29 = vector.shape_cast %28 : vector<8x1xi1> to vector<8x1xi1>
    %30 = vector.broadcast %29 : vector<8x1xi1> to vector<8x128xi1>
    %31 = arith.select %30, %26, %18 : vector<8x128xi1>, vector<8x128xf32>
    %32 = arith.maximumf %22, %26 : vector<8x128xf32>
    %33 = vector.shape_cast %28 : vector<8x1xi1> to vector<8x1xi1>
    %34 = vector.broadcast %33 : vector<8x1xi1> to vector<8x128xi1>
    %35 = arith.select %34, %32, %22 : vector<8x128xi1>, vector<8x128xf32>
    %36 = vector.extract_strided_slice %5 {offsets = [16, 0], sizes = [8, 128], strides = [1, 1]} : vector<64x128xf32> to vector<8x128xf32>
    %cst_13 = arith.constant dense<0.000000e+00> : vector<8x128xf32>
    %37 = tpu.matmul %31, %7, %cst_13 {dimension_numbers = #tpu.dot_dimension_numbers<[1], [0], [0], [1], [0, 0, 1, 1], [], []>} : vector<8x128xf32>, vector<128x128xf32>, vector<8x128xf32> -> vector<8x128xf32>
    %38 = arith.addf %36, %37 : vector<8x128xf32>
    %39 = math.tanh %38 : vector<8x128xf32>
    %c2_i32 = arith.constant 2 : i32
    %40 = vector.broadcast %c2_i32 : i32 to vector<8x1xi32>
    %41 = arith.cmpi sgt, %6, %40 : vector<8x1xi32>
    %42 = vector.shape_cast %41 : vector<8x1xi1> to vector<8x1xi1>
    %43 = vector.broadcast %42 : vector<8x1xi1> to vector<8x128xi1>
    %44 = arith.select %43, %39, %31 : vector<8x128xi1>, vector<8x128xf32>
    %45 = arith.maximumf %35, %39 : vector<8x128xf32>
    %46 = vector.shape_cast %41 : vector<8x1xi1> to vector<8x1xi1>
    %47 = vector.broadcast %46 : vector<8x1xi1> to vector<8x128xi1>
    %48 = arith.select %47, %45, %35 : vector<8x128xi1>, vector<8x128xf32>
    %49 = vector.extract_strided_slice %5 {offsets = [24, 0], sizes = [8, 128], strides = [1, 1]} : vector<64x128xf32> to vector<8x128xf32>
    %cst_14 = arith.constant dense<0.000000e+00> : vector<8x128xf32>
    %50 = tpu.matmul %44, %7, %cst_14 {dimension_numbers = #tpu.dot_dimension_numbers<[1], [0], [0], [1], [0, 0, 1, 1], [], []>} : vector<8x128xf32>, vector<128x128xf32>, vector<8x128xf32> -> vector<8x128xf32>
    %51 = arith.addf %49, %50 : vector<8x128xf32>
    %52 = math.tanh %51 : vector<8x128xf32>
    %c3_i32 = arith.constant 3 : i32
    %53 = vector.broadcast %c3_i32 : i32 to vector<8x1xi32>
    %54 = arith.cmpi sgt, %6, %53 : vector<8x1xi32>
    %55 = vector.shape_cast %54 : vector<8x1xi1> to vector<8x1xi1>
    %56 = vector.broadcast %55 : vector<8x1xi1> to vector<8x128xi1>
    %57 = arith.select %56, %52, %44 : vector<8x128xi1>, vector<8x128xf32>
    %58 = arith.maximumf %48, %52 : vector<8x128xf32>
    %59 = vector.shape_cast %54 : vector<8x1xi1> to vector<8x1xi1>
    %60 = vector.broadcast %59 : vector<8x1xi1> to vector<8x128xi1>
    %61 = arith.select %60, %58, %48 : vector<8x128xi1>, vector<8x128xf32>
    %62 = vector.extract_strided_slice %5 {offsets = [32, 0], sizes = [8, 128], strides = [1, 1]} : vector<64x128xf32> to vector<8x128xf32>
    %cst_15 = arith.constant dense<0.000000e+00> : vector<8x128xf32>
    %63 = tpu.matmul %57, %7, %cst_15 {dimension_numbers = #tpu.dot_dimension_numbers<[1], [0], [0], [1], [0, 0, 1, 1], [], []>} : vector<8x128xf32>, vector<128x128xf32>, vector<8x128xf32> -> vector<8x128xf32>
    %64 = arith.addf %62, %63 : vector<8x128xf32>
    %65 = math.tanh %64 : vector<8x128xf32>
    %c4_i32 = arith.constant 4 : i32
    %66 = vector.broadcast %c4_i32 : i32 to vector<8x1xi32>
    %67 = arith.cmpi sgt, %6, %66 : vector<8x1xi32>
    %68 = vector.shape_cast %67 : vector<8x1xi1> to vector<8x1xi1>
    %69 = vector.broadcast %68 : vector<8x1xi1> to vector<8x128xi1>
    %70 = arith.select %69, %65, %57 : vector<8x128xi1>, vector<8x128xf32>
    %71 = arith.maximumf %61, %65 : vector<8x128xf32>
    %72 = vector.shape_cast %67 : vector<8x1xi1> to vector<8x1xi1>
    %73 = vector.broadcast %72 : vector<8x1xi1> to vector<8x128xi1>
    %74 = arith.select %73, %71, %61 : vector<8x128xi1>, vector<8x128xf32>
    %75 = vector.extract_strided_slice %5 {offsets = [40, 0], sizes = [8, 128], strides = [1, 1]} : vector<64x128xf32> to vector<8x128xf32>
    %cst_16 = arith.constant dense<0.000000e+00> : vector<8x128xf32>
    %76 = tpu.matmul %70, %7, %cst_16 {dimension_numbers = #tpu.dot_dimension_numbers<[1], [0], [0], [1], [0, 0, 1, 1], [], []>} : vector<8x128xf32>, vector<128x128xf32>, vector<8x128xf32> -> vector<8x128xf32>
    %77 = arith.addf %75, %76 : vector<8x128xf32>
    %78 = math.tanh %77 : vector<8x128xf32>
    %c5_i32 = arith.constant 5 : i32
    %79 = vector.broadcast %c5_i32 : i32 to vector<8x1xi32>
    %80 = arith.cmpi sgt, %6, %79 : vector<8x1xi32>
    %81 = vector.shape_cast %80 : vector<8x1xi1> to vector<8x1xi1>
    %82 = vector.broadcast %81 : vector<8x1xi1> to vector<8x128xi1>
    %83 = arith.select %82, %78, %70 : vector<8x128xi1>, vector<8x128xf32>
    %84 = arith.maximumf %74, %78 : vector<8x128xf32>
    %85 = vector.shape_cast %80 : vector<8x1xi1> to vector<8x1xi1>
    %86 = vector.broadcast %85 : vector<8x1xi1> to vector<8x128xi1>
    %87 = arith.select %86, %84, %74 : vector<8x128xi1>, vector<8x128xf32>
    %88 = vector.extract_strided_slice %5 {offsets = [48, 0], sizes = [8, 128], strides = [1, 1]} : vector<64x128xf32> to vector<8x128xf32>
    %cst_17 = arith.constant dense<0.000000e+00> : vector<8x128xf32>
    %89 = tpu.matmul %83, %7, %cst_17 {dimension_numbers = #tpu.dot_dimension_numbers<[1], [0], [0], [1], [0, 0, 1, 1], [], []>} : vector<8x128xf32>, vector<128x128xf32>, vector<8x128xf32> -> vector<8x128xf32>
    %90 = arith.addf %88, %89 : vector<8x128xf32>
    %91 = math.tanh %90 : vector<8x128xf32>
    %c6_i32 = arith.constant 6 : i32
    %92 = vector.broadcast %c6_i32 : i32 to vector<8x1xi32>
    %93 = arith.cmpi sgt, %6, %92 : vector<8x1xi32>
    %94 = vector.shape_cast %93 : vector<8x1xi1> to vector<8x1xi1>
    %95 = vector.broadcast %94 : vector<8x1xi1> to vector<8x128xi1>
    %96 = arith.select %95, %91, %83 : vector<8x128xi1>, vector<8x128xf32>
    %97 = arith.maximumf %87, %91 : vector<8x128xf32>
    %98 = vector.shape_cast %93 : vector<8x1xi1> to vector<8x1xi1>
    %99 = vector.broadcast %98 : vector<8x1xi1> to vector<8x128xi1>
    %100 = arith.select %99, %97, %87 : vector<8x128xi1>, vector<8x128xf32>
    %101 = vector.extract_strided_slice %5 {offsets = [56, 0], sizes = [8, 128], strides = [1, 1]} : vector<64x128xf32> to vector<8x128xf32>
    %cst_18 = arith.constant dense<0.000000e+00> : vector<8x128xf32>
    %102 = tpu.matmul %96, %7, %cst_18 {dimension_numbers = #tpu.dot_dimension_numbers<[1], [0], [0], [1], [0, 0, 1, 1], [], []>} : vector<8x128xf32>, vector<128x128xf32>, vector<8x128xf32> -> vector<8x128xf32>
    %103 = arith.addf %101, %102 : vector<8x128xf32>
    %104 = math.tanh %103 : vector<8x128xf32>
    %c7_i32 = arith.constant 7 : i32
    %105 = vector.broadcast %c7_i32 : i32 to vector<8x1xi32>
    %106 = arith.cmpi sgt, %6, %105 : vector<8x1xi32>
    %107 = arith.maximumf %100, %104 : vector<8x128xf32>
    %108 = vector.shape_cast %106 : vector<8x1xi1> to vector<8x1xi1>
    %109 = vector.broadcast %108 : vector<8x1xi1> to vector<8x128xi1>
    %110 = arith.select %109, %107, %100 : vector<8x128xi1>, vector<8x128xf32>
    %c0_i32_19 = arith.constant 0 : i32
    %111 = vector.broadcast %c0_i32_19 : i32 to vector<8x1xi32>
    %112 = arith.cmpi sgt, %6, %111 : vector<8x1xi32>
    %cst_20 = arith.constant 0.000000e+00 : f32
    %113 = vector.shape_cast %112 : vector<8x1xi1> to vector<8x1xi1>
    %114 = vector.broadcast %113 : vector<8x1xi1> to vector<8x128xi1>
    %115 = vector.broadcast %cst_20 : f32 to vector<8x128xf32>
    %116 = arith.select %114, %110, %115 : vector<8x128xi1>, vector<8x128xf32>
    %c0_21 = arith.constant 0 : index
    %c0_22 = arith.constant 0 : index
    %117 = vector.load %arg7[%c0_21, %c0_22] : memref<128x128xf32, #tpu.memory_space<vmem>>, vector<128x128xf32>
    %cst_23 = arith.constant dense<0.000000e+00> : vector<8x128xf32>
    %118 = tpu.matmul %116, %117, %cst_23 {dimension_numbers = #tpu.dot_dimension_numbers<[1], [0], [0], [1], [0, 0, 1, 1], [], []>} : vector<8x128xf32>, vector<128x128xf32>, vector<8x128xf32> -> vector<8x128xf32>
    %c0_24 = arith.constant 0 : index
    %c0_25 = arith.constant 0 : index
    %119 = vector.load %arg8[%c0_24, %c0_25] : memref<1x128xf32, #tpu.memory_space<vmem>>, vector<1x128xf32>
    %120 = vector.broadcast %119 : vector<1x128xf32> to vector<8x128xf32>
    %121 = arith.addf %118, %120 : vector<8x128xf32>
    %c0_26 = arith.constant 0 : index
    %c0_27 = arith.constant 0 : index
    %122 = vector.load %arg10[%c0_26, %c0_27] : memref<8x128xf32, #tpu.memory_space<vmem>>, vector<8x128xf32>
    tpu.vector_store %arg10[%c0_26, %c0_27], %121 {strides = array<i32>} : memref<8x128xf32, #tpu.memory_space<vmem>>, vector<8x128xf32>,
    %123 = tpu.iota {dimensions = array<i32: 1>} : vector<8x128xi32>
    %c4_i32_28 = arith.constant 4 : i32
    %124 = vector.broadcast %c4_i32_28 : i32 to vector<8x128xi32>
    %125 = arith.cmpi slt, %123, %124 : vector<8x128xi32>
    %cst_29 = arith.constant -1.000000e+30 : f32
    %126 = vector.broadcast %cst_29 : f32 to vector<8x128xf32>
    %127 = arith.select %125, %121, %126 : vector<8x128xi1>, vector<8x128xf32>
    %cst_30 = arith.constant dense<0xFF800000> : vector<8xf32>
    %128 = vector.multi_reduction <maximumf>, %127, %cst_30 [1] : vector<8x128xf32> to vector<8xf32>
    %129 = vector.shape_cast %128 : vector<8xf32> to vector<8x1xf32>
    %130 = vector.broadcast %129 : vector<8x1xf32> to vector<8x128xf32>
    %131 = arith.subf %127, %130 : vector<8x128xf32>
    %132 = math.exp %131 : vector<8x128xf32>
    %cst_31 = arith.constant dense<0.000000e+00> : vector<8xf32>
    %133 = vector.multi_reduction <add>, %132, %cst_31 [1] : vector<8x128xf32> to vector<8xf32>
    %134 = vector.shape_cast %133 : vector<8xf32> to vector<8x1xf32>
    %135 = math.log %134 : vector<8x1xf32>
    %136 = arith.addf %135, %129 : vector<8x1xf32>
    %c0_32 = arith.constant 0 : index
    %c0_33 = arith.constant 0 : index
    %137 = vector.load %arg2[%c0_32, %c0_33] : memref<8x1xi32, #tpu.memory_space<vmem>>, vector<8x1xi32>
    %138 = vector.broadcast %137 : vector<8x1xi32> to vector<8x128xi32>
    %139 = arith.cmpi eq, %123, %138 : vector<8x128xi32>
    %140 = arith.extui %139 : vector<8x128xi1> to vector<8x128xi32>
    %141 = arith.sitofp %140 : vector<8x128xi32> to vector<8x128xf32>
    %142 = arith.mulf %121, %141 : vector<8x128xf32>
    %cst_34 = arith.constant dense<0.000000e+00> : vector<8xf32>
    %143 = vector.multi_reduction <add>, %142, %cst_34 [1] : vector<8x128xf32> to vector<8xf32>
    %144 = vector.shape_cast %143 : vector<8xf32> to vector<8x1xf32>
    %145 = arith.subf %136, %144 : vector<8x1xf32>
    %c0_35 = arith.constant 0 : index
    %c0_36 = arith.constant 0 : index
    %146 = vector.load %arg3[%c0_35, %c0_36] : memref<8x1xf32, #tpu.memory_space<vmem>>, vector<8x1xf32>
    %147 = arith.negf %146 : vector<8x1xf32>
    %148 = math.exp %147 : vector<8x1xf32>
    %cst_37 = arith.constant 1.000000e+00 : f32
    %149 = vector.broadcast %cst_37 : f32 to vector<8x1xf32>
    %150 = arith.addf %149, %148 : vector<8x1xf32>
    %151 = arith.divf %149, %150 : vector<8x1xf32>
    %c0_38 = arith.constant 0 : index
    %c0_39 = arith.constant 0 : index
    %152 = vector.load %arg9[%c0_38, %c0_39] : memref<56x128xf32, #tpu.memory_space<vmem>>, vector<56x128xf32>
    %c0_40 = arith.constant 0 : index
    %c0_41 = arith.constant 0 : index
    %153 = vector.load %arg9[%c0_40, %c0_41] : memref<56x128xf32, #tpu.memory_space<vmem>>, vector<56x128xf32>
    %154 = arith.mulf %152, %153 : vector<56x128xf32>
    %155 = vector.shape_cast %154 : vector<56x128xf32> to vector<1x56x128xf32>
    %cst_42 = arith.constant dense<0.000000e+00> : vector<1xf32>
    %156 = vector.multi_reduction <add>, %155, %cst_42 [1, 2] : vector<1x56x128xf32> to vector<1xf32>
    %157 = vector.shape_cast %156 : vector<1xf32> to vector<1x1x1xf32>
    %158 = vector.extract %157[0, 0, 0] : f32 from vector<1x1x1xf32>
    %159 = math.sqrt %158 : f32
    %cst_43 = arith.constant 9.99999974E-5 : f32
    %160 = arith.mulf %cst_43, %159 : f32
    %161 = arith.mulf %151, %145 : vector<8x1xf32>
    %162 = vector.shape_cast %161 : vector<8x1xf32> to vector<1x8x1xf32>
    %cst_44 = arith.constant dense<0.000000e+00> : vector<1xf32>
    %163 = vector.multi_reduction <add>, %162, %cst_44 [1, 2] : vector<1x8x1xf32> to vector<1xf32>
    %164 = vector.shape_cast %163 : vector<1xf32> to vector<1x1x1xf32>
    %165 = vector.extract %164[0, 0, 0] : f32 from vector<1x1x1xf32>
    %cst_45 = arith.constant 8.000000e+00 : f32
    %166 = arith.divf %165, %cst_45 : f32
    %167 = arith.addf %166, %160 : f32
    %c0_46 = arith.constant 0 : index
    %c0_47 = arith.constant 0 : index
    %168 = memref.load %arg11[%c0_46, %c0_47] : memref<1x1xf32, #tpu.memory_space<smem>>
    memref.store %167, %arg11[%c0_46, %c0_47] : memref<1x1xf32, #tpu.memory_space<smem>>
    %169 = vector.broadcast %129 : vector<8x1xf32> to vector<8x128xf32>
    %170 = arith.cmpf oeq, %127, %169 : vector<8x128xf32>
    %171 = arith.andi %170, %125 : vector<8x128xi1>
    %c128_i32 = arith.constant 128 : i32
    %172 = vector.broadcast %c128_i32 : i32 to vector<8x128xi32>
    %173 = arith.select %171, %123, %172 : vector<8x128xi1>, vector<8x128xi32>
    %cst_48 = arith.constant dense<2147483647> : vector<8xi32>
    %174 = vector.multi_reduction <minsi>, %173, %cst_48 [1] : vector<8x128xi32> to vector<8xi32>
    %175 = vector.shape_cast %174 : vector<8xi32> to vector<8x1xi32>
    %176 = vector.shape_cast %175 : vector<8x1xi32> to vector<8x1xi32>
    %177 = vector.broadcast %176 : vector<8x1xi32> to vector<8x128xi32>
    %c0_49 = arith.constant 0 : index
    %c0_50 = arith.constant 0 : index
    %178 = vector.load %arg12[%c0_49, %c0_50] : memref<8x128xi32, #tpu.memory_space<vmem>>, vector<8x128xi32>
    tpu.vector_store %arg12[%c0_49, %c0_50], %177 {strides = array<i32>} : memref<8x128xi32, #tpu.memory_space<vmem>>, vector<8x128xi32>,
    return
  }
}

</mosaic_0001>

<bundles_post_ra>
// kernel: tpu_custom_call.1
= control target key start
LH: loop header
LB: loop body
LE: loop exit
PB: predicated region body
PF: predicated region fallthrough
CT: control target
= control target key end

     0   :  { %18 = vsyncpa [#allocation3], 0  ;;  %s2543_s0 = inlined_call_operand.vmem [shape: f32[64,32], index: 0, kind: input, shape index: {}]   ;;  %s2544_s1 = inlined_call_operand.vmem [shape: s32[8,1], index: 1, kind: input, shape index: {}]   ;;  %s2545_s2 = inlined_call_operand.vmem [shape: s32[8,1], index: 2, kind: input, shape index: {}]   ;;  %s2546_s3 = inlined_call_operand.vmem [shape: f32[8,1], index: 3, kind: input, shape index: {}]   ;;  %s2547_s4 = inlined_call_operand.hbm [shape: f32[32,128], index: 4, kind: input, shape index: {}]   ;;  %s2548_s5 = inlined_call_operand.vmem [shape: f32[128,128], index: 5, kind: input, shape index: {}]   ;;  %s2549_s6 = inlined_call_operand.vmem [shape: f32[1,128], index: 6, kind: input, shape index: {}]   ;;  %s2550_s7 = inlined_call_operand.hbm [shape: f32[128,128], index: 7, kind: input, shape index: {}]   ;;  %s2551_s8 = inlined_call_operand.vmem [shape: f32[1,128], index: 8, kind: input, shape index: {}]   ;;  %s2552_s9 = inlined_call_operand.hbm [shape: f32[56,128], index: 9, kind: input, shape index: {}]   ;;  %s2553_s10 = inlined_call_operand.hbm [shape: f32[8,128], index: 10, kind: output, shape index: {0}]   ;;  %s2554_s11 = inlined_call_operand.hbm [shape: f32[1,1], index: 11, kind: output, shape index: {1}]   ;;  %s2555_s12 = inlined_call_operand.hbm [shape: s32[8,128], index: 12, kind: output, shape index: {2}]  }
   0x1   :  { %19 = vsyncpa [#allocation7], 0 }
   0x2   :  { %20 = vsyncpa [#allocation4], 0 }
   0x3   :  { %21 = vsyncpa [#allocation5], 0 }
   0x4   :  { %22 = vsyncpa [#allocation12], 0  ;;  %s2053_s21 = smov [#allocation6]   ;;  %s2054_s23 = smov [#allocation2]  }
   0x5   :  { %s52_s22 = sshll.u32 %s2053_s21, 4  ;;  %s36_s24 = sshll.u32 %s2054_s23, 4  ;;  %s53_s22 = int_to_ptr.vmem [resolvable:$true] %s52_s22  ;;  %s2130_s24 = int_to_ptr.vmem [resolvable:$true] %s36_s24 }
   0x6   :  { %s1923_s27 = scalar_lea.hbm %s2550_s7, 2048 }
   0x7   :  { %p1924_p0 = scmp.ne.s32.totalorder %s2550_s7, %s1923_s27  ;;  %p1927_p1 = scmp.lt.u32.totalorder %s1923_s27, %s2550_s7 }
   0x9   :  { %p1929_p2 = pnand %p1927_p1, %p1924_p0 }
   0xb   :  { %1932 = shalt.err (!%p1929_p2)
}
   0xc   :  { %s1933_s14 = scalar_lea.vmem %s53_s22, 2048  ;;  %p1938_p4 = scmp.lt.s32.totalorder %s53_s22, %s53_s22 }
   0xd   :  { %p1934_p3 = scmp.ne.s32.totalorder %s53_s22, %s1933_s14  ;;  %p1939_p5 = scmp.lt.s32.totalorder %s1933_s14, %s1933_s14 }
   0xf   :  { %p1940_p6 = por %p1939_p5, %p1938_p4 }
  0x11   :  { %p1941_p7 = pnand %p1940_p6, %p1934_p3 }
  0x13   :  { %1944 = shalt.err (!%p1941_p7)
}
  0x14   :  { %s2055_s15 = smov 128   ;;  %s2056_s16 = smov 8  }
  0x15   :  { %58 = dma.hbm_to_vmem [thread:$0]  %s2550_s7, 2048, %s53_s22, [#allocation7], %s2055_s15, %s2055_s15, %s2056_s16  }
  0x16   :  { %s1945_s21 = scalar_lea.hbm %s2547_s4, 512 }
  0x17   :  { %p1946_p8 = scmp.ne.s32.totalorder %s2547_s4, %s1945_s21  ;;  %p1949_p9 = scmp.lt.u32.totalorder %s1945_s21, %s2547_s4 }
  0x19   :  { %p1951_p10 = pnand %p1949_p9, %p1946_p8 }
  0x1b   :  { %1954 = shalt.err (!%p1951_p10)
}
  0x1c   :  { %s1955_s28 = scalar_lea.vmem %s2130_s24, 512  ;;  %p1960_p12 = scmp.lt.s32.totalorder %s2130_s24, %s2130_s24 }
  0x1d   :  { %p1956_p11 = scmp.ne.s32.totalorder %s2130_s24, %s1955_s28  ;;  %p1961_p13 = scmp.lt.s32.totalorder %s1955_s28, %s1955_s28 }
  0x1f   :  { %p1962_p0 = por %p1961_p13, %p1960_p12 }
  0x21   :  { %p1963_p1 = pnand %p1962_p0, %p1956_p11 }
  0x23   :  { %1966 = shalt.err (!%p1963_p1)
}
  0x24   :  { %42 = dma.hbm_to_vmem [thread:$0]  %s2547_s4, 512, %s2130_s24, [#allocation3], %s2055_s15, %s2055_s15, %s2056_s16  }
  0x25   :  { %s2057_s29 = smov [#allocation8]   ;;  %s1967_s17 = scalar_lea.hbm %s2552_s9, 896 }
  0x26   :  { %s66_s30 = sshll.u32 %s2057_s29, 4  ;;  %p1968_p2 = scmp.ne.s32.totalorder %s2552_s9, %s1967_s17  ;;  %s67_s30 = int_to_ptr.vmem [resolvable:$true] %s66_s30 }
  0x27   :  { %p1971_p3 = scmp.lt.u32.totalorder %s1967_s17, %s2552_s9 }
  0x29   :  { %p1973_p4 = pnand %p1971_p3, %p1968_p2 }
  0x2b   :  { %1976 = shalt.err (!%p1973_p4)
}
  0x2c   :  { %s1977_s23 = scalar_lea.vmem %s67_s30, 896  ;;  %p1982_p6 = scmp.lt.s32.totalorder %s67_s30, %s67_s30 }
  0x2d   :  { %p1978_p5 = scmp.ne.s32.totalorder %s67_s30, %s1977_s23  ;;  %p1983_p7 = scmp.lt.s32.totalorder %s1977_s23, %s1977_s23 }
  0x2f   :  { %p1984_p8 = por %p1983_p7, %p1982_p6 }
  0x31   :  { %p1985_p9 = pnand %p1984_p8, %p1978_p5 }
  0x33   :  { %1988 = shalt.err (!%p1985_p9)
}
  0x34   :  { %72 = dma.hbm_to_vmem [thread:$0]  %s2552_s9, 896, %s67_s30, [#allocation7], %s2055_s15, %s2055_s15, %s2056_s16  }
  0x35   :  { %2043 = dma.done.wait [#allocation3], 512  }
  0x36   :  { %2044 = vsyncadd [#allocation3], 4294966784 }
  0x37   :  { %2045 = dma.done.wait [#allocation7], 2944  }
  0x38   :  { %2046 = vsyncadd [#allocation7], 4294964352  ;;  %v2058_v0 = vmov 0.0|0.0   ;;  %vm2059_vm0 = vmmov 0   ;;  %v2060_v1 = vmov 0.0   ;;  %v2061_v2 = vmov 0  }
  0x39   :  { %1661 = vmatprep.subr.bf16.mxu1 %v2058_v0  ;;  %1370 = vmatprep.mubr.msk.f32.mxu1 %vm2059_vm0, %v2060_v1  ;;  %v232_v3 = vld [vmem:[%s2548_s5] sm:$0xff]  ;;  %v233_v4 = vld [vmem:[%s2548_s5 + $0x8] sm:$0xff]  ;;  %v234_v5 = vld [vmem:[%s2548_s5 + $0x10] sm:$0xff]  ;;  %vm101_vm1 = vcmask 261120  }
  0x3a   :  { %1895 = vset.pattern.permute.xlu0 %v2061_v2  ;;  %1896 = vset.pattern.permute.xlu1 %v2061_v2  ;;  %v2196_v6 = vpack.c.bf16 %v233_v4, %v232_v3  ;;  %v235_v7 = vld [vmem:[%s2548_s5 + $0x18] sm:$0xff]  ;;  %v90_v9 = vld [vmem:[#allocation2] sm:$0xff]  ;;  %v91_v10 = vld [vmem:[#allocation2 + $0x8] sm:$0xff] }
  0x3b   :  { %v2202_v8 = vpack.c.bf16 %v235_v7, %v234_v5  ;;  %v236_v11 = vld [vmem:[%s2548_s5 + $0x20] sm:$0xff]  ;;  %v237_v12 = vld [vmem:[%s2548_s5 + $0x28] sm:$0xff]  ;;  %v1653_v13 = vpack.c.bf16 %v91_v10, %v90_v9  ;;  %v92_v14 = vld [vmem:[#allocation2 + $0x10] sm:$0xff] }
  0x3c   :  { %1663 = vmatpush3.bf16.msra.mxu1 %v2196_v6  ;;  %v93_v15 = vld [vmem:[#allocation2 + $0x18] sm:$0xff]  ;;  %v82_v17 = vld [vmem:[%s2543_s0] sm:$0xff]  ;;  %v2215_v18 = vpack.c.bf16 %v237_v12, %v236_v11  ;;  %v238_v20 = vld [vmem:[%s2548_s5 + $0x30] sm:$0xff] }
  0x3d   :  { %1664 = vmatprep.subr.bf16.mxu1 %v2058_v0  ;;  %1654 = vmatprep.subr.bf16.mxu0 %v1653_v13  ;;  %v1657_v16 = vpack.c.bf16 %v93_v15, %v92_v14  ;;  %v2220_v19 = vld [vmem:[%s2544_s1] sm:$0xff]  ;;  %v239_v21 = vld [vmem:[%s2548_s5 + $0x38] sm:$0xff]  ;;  %v83_v24 = vld [vmem:[%s2543_s0 + $0x8] sm:$0xff] }
  0x3e   :  { %1656 = vmatpush3.bf16.msra.mxu0 %v1653_v13  ;;  %vm320_vm2 = vcmp.gt.s32.totalorder %v2220_v19, 0  ;;  %vm400_vm3 = vcmp.gt.s32.totalorder %v2220_v19, 1  ;;  %1326 = vmatprep.mubr.msk.f32.mxu0 %vm101_vm1, %v82_v17  ;;  %v2234_v23 = vpack.c.bf16 %v239_v21, %v238_v20  ;;  %v240_v26 = vld [vmem:[%s2548_s5 + $0x40] sm:$0xff]  ;;  %v241_v27 = vld [vmem:[%s2548_s5 + $0x48] sm:$0xff]  ;;  %vm643_vm4 = vcmp.gt.s32.totalorder %v2220_v19, 4  ;;  %v242_v30 = vld [vmem:[%s2548_s5 + $0x50] sm:$0xff] }
  0x3f   :  { %1658 = vmatprep.subr.bf16.mxu0 %v1657_v16  ;;  %v321_v22 = vsel %vm320_vm2, 1, %v2061_v2  ;;  %v401_v25 = vsel %vm400_vm3, 1, %v2061_v2  ;;  %v2251_v28 = vpack.c.bf16 %v241_v27, %v240_v26  ;;  %v644_v29 = vsel %vm643_vm4, 1, %v2061_v2  ;;  %v243_v31 = vld [vmem:[%s2548_s5 + $0x58] sm:$0xff]  ;;  %v244_v34 = vld [vmem:[%s2548_s5 + $0x60] sm:$0xff]  ;;  %v245_v35 = vld [vmem:[%s2548_s5 + $0x68] sm:$0xff] }
  0x40   :  { %1666 = vmatpush3.bf16.msra.mxu1 %v2202_v8  ;;  %323 = vperm.xlu0 %1895, %v321_v22   ;;  %vm805_vm5 = vcmp.gt.s32.totalorder %v2220_v19, 6  ;;  %v2265_v32 = vpack.c.bf16 %v243_v31, %v242_v30  ;;  %v2278_v36 = vpack.c.bf16 %v245_v35, %v244_v34  ;;  %v246_v37 = vld [vmem:[%s2548_s5 + $0x70] sm:$0xff]  ;;  %v247_v38 = vld [vmem:[%s2548_s5 + $0x78] sm:$0xff]  ;;  %v86_v42 = vld [vmem:[%s2543_s0 + $0x20] sm:$0xff]  ;;  %vm481_vm7 = vcmp.gt.s32.totalorder %v2220_v19, 2 }
  0x41   :  { %1667 = vmatprep.subr.bf16.mxu1 %v2058_v0  ;;  %v806_v33 = vsel %vm805_vm5, 1, %v2061_v2  ;;  %v2290_v39 = vpack.c.bf16 %v247_v38, %v246_v37  ;;  %v84_v40 = vld [vmem:[%s2543_s0 + $0x10] sm:$0xff]  ;;  %v85_v41 = vld [vmem:[%s2543_s0 + $0x18] sm:$0xff]  ;;  %v87_v43 = vld [vmem:[%s2543_s0 + $0x28] sm:$0xff]  ;;  %vm562_vm8 = vcmp.gt.s32.totalorder %v2220_v19, 3  ;;  %v482_v61 = vsel %vm481_vm7, 1, %v2061_v2 }
  0x42   :  { %1660 = vmatpush3.bf16.msra.mxu0 %v1657_v16  ;;  %v88_v44 = vld [vmem:[%s2543_s0 + $0x30] sm:$0xff]  ;;  %v89_v45 = vld [vmem:[%s2543_s0 + $0x38] sm:$0xff]  ;;  %v2353_v48 = vld [vmem:[%s2549_s6] ss:$0 sm:$0xff]  ;;  %484 = vperm.xlu1 %1896, %v482_v61   ;;  %v563_v62 = vsel %vm562_vm8, 1, %v2061_v2  ;;  %vm724_vm9 = vcmp.gt.s32.totalorder %v2220_v19, 5 }
  0x43   :  { %1685 = vmatprep.subr.bf16.mxu0 %v2058_v0  ;;  %v725_v63 = vsel %vm724_vm9, 1, %v2061_v2  ;;  %vm886_vm10 = vcmp.gt.s32.totalorder %v2220_v19, 7  ;;  %v1003_v4 = vld [vmem:[%s2545_s2] sm:$0xff]  ;;  %vm1061_vm9 = vcmask 7168  }
  0x44   :  { %1669 = vmatpush3.bf16.msra.mxu1 %v2215_v18  ;;  %403 = vperm.xlu0 %1895, %v401_v25   ;;  %v888_v3 = vsel %vm886_vm10, 1, %v2061_v2  ;;  %v899_v61 = vld [vmem:[#allocation6 + $0x20] sm:$0xff] }
  0x45   :  { %1670 = vmatprep.subr.bf16.mxu1 %v2058_v0  ;;  %1327 = vmatmul.mubr.msk.f32.vlgmr.msra.gmra.mrb[0].mxu0 %vm101_vm1, %v83_v24 }
  0x46   :  { %1687 = vmatpush3.bf16.msra.mxu0 %v2196_v6  ;;  %1329 = vmatprep.mubr.msk.f32.mxu0 %vm101_vm1, %v84_v40 }
  0x47   :  { %1688 = vmatprep.subr.bf16.mxu0 %v2058_v0  ;;  %565 = vperm.xlu1 %1896, %v563_v62   ;;  %v900_v62 = vld [vmem:[#allocation6 + $0x28] sm:$0xff] }
  0x48   :  { %1672 = vmatpush3.bf16.msra.mxu1 %v2234_v23  ;;  %646 = vperm.xlu0 %1895, %v644_v29  }
  0x49   :  { %1673 = vmatprep.subr.bf16.mxu1 %v2058_v0  ;;  %1330 = vmatmul.mubr.msk.f32.gmra.mrb[2].mxu0 %vm101_vm1, %v85_v41 }
  0x4a   :  { %1690 = vmatpush3.bf16.msra.mxu0 %v2202_v8  ;;  %1332 = vmatprep.mubr.msk.f32.mxu0 %vm101_vm1, %v86_v42 }
  0x4b   :  { %1691 = vmatprep.subr.bf16.mxu0 %v2058_v0  ;;  %727 = vperm.xlu1 %1896, %v725_v63   ;;  %v1860_v63 = vpack.c.bf16 %v900_v62, %v899_v61 }
  0x4c   :  { %1675 = vmatpush3.bf16.msra.mxu1 %v2251_v28  ;;  %808 = vperm.xlu0 %1895, %v806_v33  }
  0x4d   :  { %1676 = vmatprep.subr.bf16.mxu1 %v2058_v0  ;;  %1333 = vmatmul.mubr.msk.f32.gmra.mrb[4].mxu0 %vm101_vm1, %v87_v43 }
  0x4e   :  { %1693 = vmatpush3.bf16.msra.mxu0 %v2215_v18  ;;  %1335 = vmatprep.mubr.msk.f32.mxu0 %vm101_vm1, %v88_v44 }
  0x4f   :  { %1694 = vmatprep.subr.bf16.mxu0 %v2058_v0  ;;  %890 = vperm.xlu1 %1896, %v888_v3   ;;  %v901_v3 = vld [vmem:[#allocation6 + $0x30] sm:$0xff] }
  0x50   :  { %1678 = vmatpush3.bf16.msra.mxu1 %v2265_v32 }
  0x51   :  { %1679 = vmatprep.subr.bf16.mxu1 %v2058_v0  ;;  %1336 = vmatmul.mubr.msk.f32.gmra.mrb[6].mxu0 %vm101_vm1, %v89_v45 }
  0x52   :  { %1696 = vmatpush3.bf16.msra.mxu0 %v2234_v23  ;;  %1405 = vmatprep.mubr.msk.f32.mxu0 %vm2059_vm0, %v2060_v1 }
  0x53   :  { %1697 = vmatprep.subr.bf16.mxu0 %v2058_v0  ;;  %1005 = vperm.xlu1 %1896, %v1003_v4   ;;  %v902_v4 = vld [vmem:[#allocation6 + $0x38] sm:$0xff] }
  0x54   :  { %1681 = vmatpush3.bf16.msra.mxu1 %v2278_v36 }
  0x55   :  { %1682 = vmatprep.subr.bf16.mxu1 %v2058_v0 }
  0x56   :  { %1699 = vmatpush3.bf16.msra.mxu0 %v2251_v28 }
  0x57   :  { %1700 = vmatprep.subr.bf16.mxu0 %v2058_v0 }
  0x58   :  { %1684 = vmatpush3.bf16.msra.mxu1 %v2290_v39 }
  0x59   :  { %1709 = vmatprep.subr.bf16.mxu1 %v2058_v0 }
  0x5a   :  { %1702 = vmatpush3.bf16.msra.mxu0 %v2265_v32 }
  0x5b   :  { %1371 = vmatmul.mubr.f32.vlgmr.msra.gmra.mrb[0].mxu1 %v2060_v1  ;;  %1703 = vmatprep.subr.bf16.mxu0 %v2058_v0 }
  0x5c   :  { %1711 = vmatpush3.bf16.msra.mxu1 %v2196_v6  ;;  %1440 = vmatprep.mubr.msk.f32.mxu1 %vm2059_vm0, %v2060_v1 }
  0x5d   :  { %1712 = vmatprep.subr.bf16.mxu1 %v2058_v0 }
  0x5e   :  { %1705 = vmatpush3.bf16.msra.mxu0 %v2278_v36 }
  0x5f   :  { %1706 = vmatprep.subr.bf16.mxu0 %v2058_v0 }
  0x60   :  { %1714 = vmatpush3.bf16.msra.mxu1 %v2202_v8 }
  0x61   :  { %1715 = vmatprep.subr.bf16.mxu1 %v2058_v0 }
  0x62   :  { %1708 = vmatpush3.bf16.msra.mxu0 %v2290_v39 }
  0x63   :  { %1733 = vmatprep.subr.bf16.mxu0 %v2058_v0 }
  0x64   :  { %1717 = vmatpush3.bf16.msra.mxu1 %v2215_v18 }
  0x65   :  { %1718 = vmatprep.subr.bf16.mxu1 %v2058_v0 }
  0x68   :  { %1720 = vmatpush3.bf16.msra.mxu1 %v2234_v23 }
  0x69   :  { %1721 = vmatprep.subr.bf16.mxu1 %v2058_v0 }
  0x6c   :  { %1723 = vmatpush3.bf16.msra.mxu1 %v2251_v28 }
  0x6d   :  { %1724 = vmatprep.subr.bf16.mxu1 %v2058_v0 }
  0x70   :  { %1726 = vmatpush3.bf16.msra.mxu1 %v2265_v32 }
  0x71   :  { %1727 = vmatprep.subr.bf16.mxu1 %v2058_v0 }
  0x74   :  { %1729 = vmatpush3.bf16.msra.mxu1 %v2278_v36 }
  0x75   :  { %1730 = vmatprep.subr.bf16.mxu1 %v2058_v0 }
  0x78   :  { %1732 = vmatpush3.bf16.msra.mxu1 %v2290_v39 }
  0x79   :  { %1757 = vmatprep.subr.bf16.mxu1 %v2058_v0 }
  0xbf   :  { %v2356_v53 = vpop.permute.xlu0 %323 }
  0xc0   :  { %vm325_vm6 = vcmp.eq.s32.totalorder %v2356_v53, 1 }
  0xc1   :  { %v485_v22 = vpop.permute.xlu1 %484 }
  0xc2   :  { %vm486_vm12 = vcmp.eq.s32.totalorder %v485_v22, 1 }
  0xc3   :  { %v404_v11 = vpop.permute.xlu0 %403 }
  0xc4   :  { %vm405_vm11 = vcmp.eq.s32.totalorder %v404_v11, 1 }
  0xc6   :  { %v566_v34 = vpop.permute.xlu1 %565 }
  0xc7   :  { %vm567_vm13 = vcmp.eq.s32.totalorder %v566_v34, 1  ;;  %v647_v45 = vpop.permute.xlu0 %646 }
  0xc8   :  { %vm648_vm14 = vcmp.eq.s32.totalorder %v647_v45, 1 }
 0x118   :  { %v1328_v46 = vpop.f32.mrb[0].mxu0 }
 0x119   :  { %v192_v47 = vpop.f32.mrb[1].mxu0  ;;  %v198_v5 = vadd.f32 %v1328_v46, %v2353_v48 }
 0x11a   :  { %v193_v49 = vadd.f32 %v2353_v48, %v192_v47 }
 0x11c   :  { %v2379_v55 = vpop.f32.mrb[2].mxu0 }
 0x11d   :  { %v202_v56 = vpop.f32.mrb[3].mxu0  ;;  %v208_v29 = vadd.f32 %v2379_v55, %v2353_v48  ;;  %v896_v55 = vld [vmem:[#allocation6 + $0x8] sm:$0xff] }
 0x11e   :  { %v203_v17 = vadd.f32 %v2353_v48, %v202_v56 }
 0x120   :  { %v2381_v57 = vpop.f32.mrb[4].mxu0 }
 0x121   :  { %v2383_v58 = vpop.f32.mrb[5].mxu0 }
 0x122   :  { %v213_v41 = vadd.f32 %v2353_v48, %v2383_v58  ;;  %v898_v58 = vld [vmem:[#allocation6 + $0x18] sm:$0xff] }
 0x124   :  { %v2385_v59 = vpop.f32.mrb[6].mxu0 }
 0x125   :  { %v2387_v60 = vpop.f32.mrb[7].mxu0 }
 0x12e   :  { %v314_v50 = vpop.f32.mrb[0].mxu1 }
 0x12f   :  { %v318_v51 = vadd.f32 %v314_v50, %v193_v49  ;;  %v1372_v52 = vpop.f32.mrb[1].mxu1 }
 0x131   :  { %1897 = vtanh.f32 %v318_v51 }
 0x13b   :  { %v1898_v54 = vpop.eup %1897 }
 0x13c   :  { %1406 = vmatmul.mubr.msk.f32.vlgmr.msra.gmra.mrb[8].mxu0 %vm325_vm6, %v1898_v54  ;;  %v326_v13 = vsel %vm325_vm6, %v1898_v54, 0.0  ;;  %v327_v2 = vsel %vm325_vm6, %v1898_v54, -inf  ;;  %v895_v54 = vld [vmem:[#allocation6] sm:$0xff] }
 0x13d   :  { %1735 = vmatpush3.bf16.msra.mxu0 %v2196_v6  ;;  %1475 = vmatprep.mubr.msk.f32.mxu0 %vm2059_vm0, %v2060_v1  ;;  %v1854_v56 = vpack.c.bf16 %v896_v55, %v895_v54  ;;  %v1026_v55 = vld [vmem:[#allocation8 + $0x28] sm:$0xff] }
 0x13e   :  { %1736 = vmatprep.subr.bf16.mxu0 %v2058_v0 }
 0x141   :  { %1738 = vmatpush3.bf16.msra.mxu0 %v2202_v8 }
 0x142   :  { %1739 = vmatprep.subr.bf16.mxu0 %v2058_v0 }
 0x145   :  { %1741 = vmatpush3.bf16.msra.mxu0 %v2215_v18 }
 0x146   :  { %1742 = vmatprep.subr.bf16.mxu0 %v2058_v0 }
 0x149   :  { %1744 = vmatpush3.bf16.msra.mxu0 %v2234_v23 }
 0x14a   :  { %1745 = vmatprep.subr.bf16.mxu0 %v2058_v0 }
 0x14d   :  { %1747 = vmatpush3.bf16.msra.mxu0 %v2251_v28 }
 0x14e   :  { %1748 = vmatprep.subr.bf16.mxu0 %v2058_v0 }
 0x151   :  { %1750 = vmatpush3.bf16.msra.mxu0 %v2265_v32 }
 0x152   :  { %1751 = vmatprep.subr.bf16.mxu0 %v2058_v0 }
 0x155   :  { %1753 = vmatpush3.bf16.msra.mxu0 %v2278_v36 }
 0x156   :  { %1754 = vmatprep.subr.bf16.mxu0 %v2058_v0 }
 0x159   :  { %1756 = vmatpush3.bf16.msra.mxu0 %v2290_v39 }
 0x15a   :  { %1781 = vmatprep.subr.bf16.mxu0 %v2058_v0 }
 0x20f   :  { %v394_v7 = vpop.f32.mrb[8].mxu0 }
 0x210   :  { %v398_v9 = vadd.f32 %v394_v7, %v198_v5  ;;  %v1407_v10 = vpop.f32.mrb[9].mxu0  ;;  %v1863_v5 = vpack.c.bf16 %v902_v4, %v901_v3  ;;  %v223_v7 = vadd.f32 %v2353_v48, %v2387_v60  ;;  %v907_v60 = vld [vmem:[#allocation6 + $0x60] sm:$0xff] }
 0x212   :  { %1899 = vtanh.f32 %v398_v9 }
 0x21c   :  { %v1900_v12 = vpop.eup %1899 }
 0x21d   :  { %v407_v14 = vmax.f32 %v327_v2, %v1900_v12  ;;  %v406_v15 = vsel %vm405_vm11, %v1900_v12, %v326_v13  ;;  %v809_v12 = vpop.permute.xlu0 %808 }
 0x21e   :  { %1441 = vmatmul.mubr.f32.vlgmr.msra.gmra.mrb[2].mxu1 %v406_v15 }
 0x21f   :  { %v408_v16 = vsel %vm405_vm11, %v407_v14, %v327_v2  ;;  %1759 = vmatpush3.bf16.msra.mxu1 %v2196_v6  ;;  %1510 = vmatprep.mubr.msk.f32.mxu1 %vm2059_vm0, %v2060_v1 }
 0x220   :  { %1760 = vmatprep.subr.bf16.mxu1 %v2058_v0 }
 0x223   :  { %1762 = vmatpush3.bf16.msra.mxu1 %v2202_v8 }
 0x224   :  { %1763 = vmatprep.subr.bf16.mxu1 %v2058_v0 }
 0x227   :  { %1765 = vmatpush3.bf16.msra.mxu1 %v2215_v18 }
 0x228   :  { %1766 = vmatprep.subr.bf16.mxu1 %v2058_v0 }
 0x22b   :  { %1768 = vmatpush3.bf16.msra.mxu1 %v2234_v23 }
 0x22c   :  { %1769 = vmatprep.subr.bf16.mxu1 %v2058_v0 }
 0x22f   :  { %1771 = vmatpush3.bf16.msra.mxu1 %v2251_v28 }
 0x230   :  { %1772 = vmatprep.subr.bf16.mxu1 %v2058_v0 }
 0x233   :  { %1774 = vmatpush3.bf16.msra.mxu1 %v2265_v32 }
 0x234   :  { %1775 = vmatprep.subr.bf16.mxu1 %v2058_v0 }
 0x237   :  { %1777 = vmatpush3.bf16.msra.mxu1 %v2278_v36 }
 0x238   :  { %1778 = vmatprep.subr.bf16.mxu1 %v2058_v0 }
 0x23b   :  { %1780 = vmatpush3.bf16.msra.mxu1 %v2290_v39 }
 0x23c   :  { %1805 = vmatprep.subr.bf16.mxu1 %v2058_v0 }
 0x2f1   :  { %v475_v19 = vpop.f32.mrb[2].mxu1 }
 0x2f2   :  { %v479_v20 = vadd.f32 %v475_v19, %v203_v17  ;;  %v1442_v21 = vpop.f32.mrb[3].mxu1  ;;  %v904_v17 = vld [vmem:[#allocation6 + $0x48] sm:$0xff] }
 0x2f3   :  { %v906_v21 = vld [vmem:[#allocation6 + $0x58] sm:$0xff] }
 0x2f4   :  { %1901 = vtanh.f32 %v479_v20  ;;  %v905_v20 = vld [vmem:[#allocation6 + $0x50] sm:$0xff] }
 0x2f5   :  { %v1869_v22 = vpack.c.bf16 %v906_v21, %v905_v20 }
 0x2fe   :  { %v1902_v24 = vpop.eup %1901 }
 0x2ff   :  { %v488_v25 = vmax.f32 %v408_v16, %v1902_v24  ;;  %v487_v26 = vsel %vm486_vm12, %v1902_v24, %v406_v15  ;;  %v908_v24 = vld [vmem:[#allocation6 + $0x68] sm:$0xff] }
 0x300   :  { %1476 = vmatmul.mubr.f32.vlgmr.msra.gmra.mrb[10].mxu0 %v487_v26 }
 0x301   :  { %v489_v27 = vsel %vm486_vm12, %v488_v25, %v408_v16  ;;  %1783 = vmatpush3.bf16.msra.mxu0 %v2196_v6  ;;  %1545 = vmatprep.mubr.msk.f32.mxu0 %vm2059_vm0, %v2060_v1  ;;  %v903_v16 = vld [vmem:[#allocation6 + $0x40] sm:$0xff]  ;;  %v1872_v25 = vpack.c.bf16 %v908_v24, %v907_v60 }
 0x302   :  { %1784 = vmatprep.subr.bf16.mxu0 %v2058_v0  ;;  %v1866_v19 = vpack.c.bf16 %v904_v17, %v903_v16  ;;  %v1014_v24 = vld [vmem:[%s2546_s3] sm:$0xff]  ;;  %s2062_s3 = smov [#allocation9]  }
 0x303   :  { %s1102_s30 = sshll.u32 %s2062_s3, 4  ;;  %s1103_s30 = int_to_ptr.vmem [resolvable:$true] %s1102_s30 }
 0x304   :  { %s1989_s13 = scalar_lea.vmem %s1103_s30, 128  ;;  %p1994_p11 = scmp.lt.s32.totalorder %s1103_s30, %s1103_s30 }
 0x305   :  { %1786 = vmatpush3.bf16.msra.mxu0 %v2202_v8  ;;  %p1990_p10 = scmp.ne.s32.totalorder %s1103_s30, %s1989_s13  ;;  %p1995_p12 = scmp.lt.s32.totalorder %s1989_s13, %s1989_s13 }
 0x306   :  { %1787 = vmatprep.subr.bf16.mxu0 %v2058_v0 }
 0x307   :  { %p1996_p13 = por %p1995_p12, %p1994_p11 }
 0x309   :  { %1789 = vmatpush3.bf16.msra.mxu0 %v2215_v18  ;;  %p1997_p0 = pnand %p1996_p13, %p1990_p10 }
 0x30a   :  { %1790 = vmatprep.subr.bf16.mxu0 %v2058_v0 }
 0x30d   :  { %1792 = vmatpush3.bf16.msra.mxu0 %v2234_v23 }
 0x30e   :  { %1793 = vmatprep.subr.bf16.mxu0 %v2058_v0 }
 0x311   :  { %1795 = vmatpush3.bf16.msra.mxu0 %v2251_v28 }
 0x312   :  { %1796 = vmatprep.subr.bf16.mxu0 %v2058_v0 }
 0x315   :  { %1798 = vmatpush3.bf16.msra.mxu0 %v2265_v32 }
 0x316   :  { %1799 = vmatprep.subr.bf16.mxu0 %v2058_v0 }
 0x319   :  { %1801 = vmatpush3.bf16.msra.mxu0 %v2278_v36 }
 0x31a   :  { %1802 = vmatprep.subr.bf16.mxu0 %v2058_v0 }
 0x31d   :  { %1804 = vmatpush3.bf16.msra.mxu0 %v2290_v39 }
 0x31e   :  { %1829 = vmatprep.subr.bf16.mxu0 %v2058_v0 }
 0x3d3   :  { %v556_v30 = vpop.f32.mrb[10].mxu0 }
 0x3d4   :  { %v560_v31 = vadd.f32 %v556_v30, %v208_v29  ;;  %v1477_v33 = vpop.f32.mrb[11].mxu0  ;;  %v228_v30 = vadd.f32 %v2385_v59, %v2353_v48 }
 0x3d6   :  { %1903 = vtanh.f32 %v560_v31 }
 0x3e0   :  { %v1904_v35 = vpop.eup %1903 }
 0x3e1   :  { %v569_v37 = vmax.f32 %v489_v27, %v1904_v35  ;;  %v568_v38 = vsel %vm567_vm13, %v1904_v35, %v487_v26  ;;  %v909_v26 = vld [vmem:[#allocation6 + $0x70] sm:$0xff] }
 0x3e2   :  { %1511 = vmatmul.mubr.f32.vlgmr.msra.gmra.mrb[4].mxu1 %v568_v38 }
 0x3e3   :  { %v570_v40 = vsel %vm567_vm13, %v569_v37, %v489_v27  ;;  %1807 = vmatpush3.bf16.msra.mxu1 %v2196_v6  ;;  %1580 = vmatprep.mubr.msk.f32.mxu1 %vm2059_vm0, %v2060_v1  ;;  %v910_v27 = vld [vmem:[#allocation6 + $0x78] sm:$0xff] }
 0x3e4   :  { %1808 = vmatprep.subr.bf16.mxu1 %v2058_v0  ;;  %v1875_v29 = vpack.c.bf16 %v910_v27, %v909_v26 }
 0x3e7   :  { %1810 = vmatpush3.bf16.msra.mxu1 %v2202_v8 }
 0x3e8   :  { %1811 = vmatprep.subr.bf16.mxu1 %v2058_v0 }
 0x3eb   :  { %1813 = vmatpush3.bf16.msra.mxu1 %v2215_v18 }
 0x3ec   :  { %1814 = vmatprep.subr.bf16.mxu1 %v2058_v0 }
 0x3ef   :  { %1816 = vmatpush3.bf16.msra.mxu1 %v2234_v23 }
 0x3f0   :  { %1817 = vmatprep.subr.bf16.mxu1 %v2058_v0 }
 0x3f3   :  { %1819 = vmatpush3.bf16.msra.mxu1 %v2251_v28 }
 0x3f4   :  { %1820 = vmatprep.subr.bf16.mxu1 %v2058_v0 }
 0x3f7   :  { %1822 = vmatpush3.bf16.msra.mxu1 %v2265_v32 }
 0x3f8   :  { %1823 = vmatprep.subr.bf16.mxu1 %v2058_v0 }
 0x3fb   :  { %1825 = vmatpush3.bf16.msra.mxu1 %v2278_v36 }
 0x3fc   :  { %1826 = vmatprep.subr.bf16.mxu1 %v2058_v0 }
 0x3ff   :  { %1828 = vmatpush3.bf16.msra.mxu1 %v2290_v39 }
 0x400   :  { %1853 = vmatprep.subr.bf16.mxu1 %v2058_v0 }
 0x4b5   :  { %v637_v42 = vpop.f32.mrb[4].mxu1 }
 0x4b6   :  { %v641_v43 = vadd.f32 %v637_v42, %v213_v41  ;;  %v1512_v44 = vpop.f32.mrb[5].mxu1  ;;  %v989_v41 = vlaneseq }
 0x4b8   :  { %1905 = vtanh.f32 %v641_v43  ;;  %v990_v42 = vand.u32 127, %v989_v41 }
 0x4ba   :  { %vm991_vm2 = vcmp.lt.s32.totalorder %v990_v42, 4 }
 0x4c2   :  { %v1906_v46 = vpop.eup %1905 }
 0x4c3   :  { %v650_v47 = vmax.f32 %v570_v40, %v1906_v46  ;;  %v649_v49 = vsel %vm648_vm14, %v1906_v46, %v568_v38 }
 0x4c4   :  { %1546 = vmatmul.mubr.f32.vlgmr.msra.gmra.mrb[12].mxu0 %v649_v49 }
 0x4c5   :  { %v651_v50 = vsel %vm648_vm14, %v650_v47, %v570_v40  ;;  %1831 = vmatpush3.bf16.msra.mxu0 %v2196_v6  ;;  %1615 = vmatprep.mubr.msk.f32.mxu0 %vm2059_vm0, %v2060_v1  ;;  %v218_v6 = vadd.f32 %v2381_v57, %v2353_v48  ;;  %v1021_v47 = vld [vmem:[#allocation8] sm:$0xff] }
 0x4c6   :  { %1832 = vmatprep.subr.bf16.mxu0 %v2058_v0 }
 0x4c9   :  { %1834 = vmatpush3.bf16.msra.mxu0 %v2202_v8 }
 0x4ca   :  { %1835 = vmatprep.subr.bf16.mxu0 %v2058_v0 }
 0x4cd   :  { %1837 = vmatpush3.bf16.msra.mxu0 %v2215_v18 }
 0x4ce   :  { %1838 = vmatprep.subr.bf16.mxu0 %v2058_v0 }
 0x4d1   :  { %1840 = vmatpush3.bf16.msra.mxu0 %v2234_v23 }
 0x4d2   :  { %1841 = vmatprep.subr.bf16.mxu0 %v2058_v0 }
 0x4d5   :  { %1843 = vmatpush3.bf16.msra.mxu0 %v2251_v28  ;;  %v728_v28 = vpop.permute.xlu1 %727 }
 0x4d6   :  { %1844 = vmatprep.subr.bf16.mxu0 %v2058_v0  ;;  %vm729_vm15 = vcmp.eq.s32.totalorder %v728_v28, 1  ;;  %v1024_v28 = vld [vmem:[#allocation8 + $0x18] sm:$0xff] }
 0x4d9   :  { %1846 = vmatpush3.bf16.msra.mxu0 %v2265_v32  ;;  %v891_v37 = vpop.permute.xlu1 %890 }
 0x4da   :  { %1847 = vmatprep.subr.bf16.mxu0 %v2058_v0  ;;  %vm892_vm1 = vcmp.eq.s32.totalorder %v891_v37, 1 }
 0x4dd   :  { %1849 = vmatpush3.bf16.msra.mxu0 %v2278_v36  ;;  %v1006_v43 = vpop.permute.xlu1 %1005 }
 0x4de   :  { %1850 = vmatprep.subr.bf16.mxu0 %v2058_v0  ;;  %vm1007_vm3 = vcmp.eq.s32.totalorder %v990_v42, %v1006_v43 }
 0x4df   :  { %v1151_v46 = vsel %vm1007_vm3, 1.0, %v2060_v1 }
 0x4e1   :  { %1852 = vmatpush3.bf16.msra.mxu0 %v2290_v39  ;;  %v897_v39 = vld [vmem:[#allocation6 + $0x10] sm:$0xff] }
 0x4e2   :  { %v1857_v57 = vpack.c.bf16 %v898_v58, %v897_v39  ;;  %v1033_v39 = vmul.f32 %v1026_v55, %v1026_v55  ;;  %v1027_v58 = vld [vmem:[#allocation8 + $0x30] sm:$0xff] }
 0x597   :  { %v718_v8 = vpop.f32.mrb[12].mxu0 }
 0x598   :  { %v722_v18 = vadd.f32 %v718_v8, %v218_v6  ;;  %v1547_v23 = vpop.f32.mrb[13].mxu0  ;;  %v1023_v8 = vld [vmem:[#allocation8 + $0x10] sm:$0xff] }
 0x59a   :  { %1907 = vtanh.f32 %v722_v18  ;;  %v1030_v18 = vmul.f32 %v1023_v8, %v1023_v8 }
 0x5a4   :  { %v1908_v51 = vpop.eup %1907 }
 0x5a5   :  { %v731_v52 = vmax.f32 %v651_v50, %v1908_v51  ;;  %v730_v32 = vsel %vm729_vm15, %v1908_v51, %v649_v49  ;;  %v1022_v49 = vld [vmem:[#allocation8 + $0x8] sm:$0xff]  ;;  %v1031_v51 = vmul.f32 %v1024_v28, %v1024_v28 }
 0x5a6   :  { %1581 = vmatmul.mubr.f32.vlgmr.msra.gmra.mrb[6].mxu1 %v730_v32  ;;  %v1029_v6 = vmul.f32 %v1022_v49, %v1022_v49 }
 0x5a7   :  { %1650 = vmatprep.mubr.msk.f32.mxu1 %vm2059_vm0, %v2060_v1  ;;  %v732_v36 = vsel %vm729_vm15, %v731_v52, %v651_v50  ;;  %1855 = vmatpush3.bf16.msra.mxu1 %v1854_v56  ;;  %vm810_vm0 = vcmp.eq.s32.totalorder %v809_v12, 1  ;;  %v1028_v50 = vmul.f32 %v1021_v47, %v1021_v47  ;;  %v1034_v1 = vmul.f32 %v1027_v58, %v1027_v58 }
 0x5a8   :  { %1856 = vmatprep.subr.bf16.mxu1 %v2058_v0 }
 0x5a9   :  { %v1035_v23 = vadd.f32 %v1029_v6, %v1028_v50 }
 0x5ab   :  { %1858 = vmatpush3.bf16.msra.mxu1 %v1857_v57  ;;  %v1036_v52 = vadd.f32 %v1035_v23, %v1030_v18 }
 0x5ac   :  { %1859 = vmatprep.subr.bf16.mxu1 %v2058_v0 }
 0x5ad   :  { %v1037_v54 = vadd.f32 %v1036_v52, %v1031_v51 }
 0x5af   :  { %1861 = vmatpush3.bf16.msra.mxu1 %v1860_v63 }
 0x5b0   :  { %1862 = vmatprep.subr.bf16.mxu1 %v2058_v0 }
 0x5b3   :  { %1864 = vmatpush3.bf16.msra.mxu1 %v1863_v5 }
 0x5b4   :  { %1865 = vmatprep.subr.bf16.mxu1 %v2058_v0 }
 0x5b7   :  { %1867 = vmatpush3.bf16.msra.mxu1 %v1866_v19 }
 0x5b8   :  { %1868 = vmatprep.subr.bf16.mxu1 %v2058_v0 }
 0x5bb   :  { %1870 = vmatpush3.bf16.msra.mxu1 %v1869_v22 }
 0x5bc   :  { %1871 = vmatprep.subr.bf16.mxu1 %v2058_v0 }
 0x5bf   :  { %1873 = vmatpush3.bf16.msra.mxu1 %v1872_v25  ;;  %v1152_v25 = vmul.f32 -1.442695, %v1014_v24 }
 0x5c0   :  { %1874 = vmatprep.subr.bf16.mxu1 %v2058_v0  ;;  %v1149_v0 = vld [vmem:[%s2551_s8] ss:$0 sm:$0xff] }
 0x5c3   :  { %1876 = vmatpush3.bf16.msra.mxu1 %v1875_v29 }
 0x679   :  { %v799_v9 = vpop.f32.mrb[6].mxu1 }
 0x67a   :  { %v803_v10 = vadd.f32 %v799_v9, %v223_v7  ;;  %v1582_v11 = vpop.f32.mrb[7].mxu1 }
 0x67c   :  { %1909 = vtanh.f32 %v803_v10 }
 0x686   :  { %v1910_v13 = vpop.eup %1909 }
 0x687   :  { %v811_v2 = vsel %vm810_vm0, %v1910_v13, %v730_v32  ;;  %v812_v14 = vmax.f32 %v732_v36, %v1910_v13  ;;  %v1025_v32 = vld [vmem:[#allocation8 + $0x20] sm:$0xff] }
 0x688   :  { %1616 = vmatmul.mubr.f32.vlgmr.msra.gmra.mrb[14].mxu0 %v811_v2 }
 0x689   :  { %v813_v15 = vsel %vm810_vm0, %v812_v14, %v732_v36  ;;  %v1032_v36 = vmul.f32 %v1025_v32, %v1025_v32 }
 0x68b   :  { %v1038_v56 = vadd.f32 %v1037_v54, %v1032_v36 }
 0x68d   :  { %v1039_v57 = vadd.f32 %v1038_v56, %v1033_v39 }
 0x68f   :  { %v1040_v61 = vadd.f32 %v1039_v57, %v1034_v1 }
 0x75b   :  { %v880_v31 = vpop.f32.mrb[14].mxu0 }
 0x75c   :  { %v884_v33 = vadd.f32 %v880_v31, %v228_v30  ;;  %v1617_v34 = vpop.f32.mrb[15].mxu0 }
 0x75e   :  { %1911 = vtanh.f32 %v884_v33 }
 0x768   :  { %v1912_v35 = vpop.eup %1911 }
 0x769   :  { %v887_v38 = vmax.f32 %v813_v15, %v1912_v35 }
 0x76b   :  { %v893_v40 = vsel %vm892_vm1, %v887_v38, %v813_v15 }
 0x76c   :  { %1651 = vmatmul.mubr.msk.f32.vlgmr.msra.gmra.mrb[8].mxu1 %vm325_vm6, %v893_v40 }
 0x83f   :  { %v984_v48 = vpop.f32.mrb[8].mxu1 }
 0x840   :  { %v985_v59 = vadd.f32 %v1149_v0, %v984_v48  ;;  %v1652_v44 = vpop.f32.mrb[9].mxu1 }
 0x842   :  { %988 = vst [vmem:[#allocation9] sm:$0xff] %v985_v59  ;;  %v992_v45 = vsel %vm991_vm2, %v985_v59, -1e+30  ;;  %v1010_v53 = vmul.f32 %v1151_v46, %v985_v59 }
 0x843   :  { %993 = vmax.xlane.f32.xlu0 %v992_v45 }
 0x847   :  { %1011 = vadd.xlane.f32.xlu0 %v1010_v53 }
 0x84b   :  { %1041 = vadd.xlane.f32.xlu0 %v1040_v61 }
 0x8d0   :  { %v994_v62 = vpop.xlane.xlu0 %993 }
 0x8d1   :  { %v995_v63 = vsub.f32 %v992_v45, %v994_v62  ;;  %vm1078_vm4 = vcmp.eq.f32.partialorder %v992_v45, %v994_v62 }
 0x8d2   :  { %vm1079_vm5 = vmand %vm1078_vm4, %vm991_vm2 }
 0x8d3   :  { %v996_v3 = vmul.f32 1.442695, %v995_v63  ;;  %v1080_v4 = vsel %vm1079_vm5, %v990_v42, 128 }
 0x8d4   :  { %v1082_v5 = vshra.s32 %v1080_v4, 16  ;;  %v1012_v10 = vpop.xlane.xlu0 %1011  ;;  %v1081_v26 = vand.u32 65535, %v1080_v4 }
 0x8d5   :  { %1913 = vpow2.f32 %v996_v3 }
 0x8d6   :  { %v1084_v7 = vcvt.s32.f32 %v1082_v5  ;;  %v1083_v29 = vcvt.s32.f32 %v1081_v26 }
 0x8d8   :  { %1085 = vmin.xlane.f32.xlu0 %v1084_v7  ;;  %v1042_v11 = vpop.xlane.xlu0 %1041 }
 0x8d9   :  { %v1043_v12 = vrot.slane %v1042_v11, 4 }
 0x8db   :  { %v1044_v13 = vadd.f32 %v1043_v12, %v1042_v11 }
 0x8dd   :  { %v1045_v2 = vrot.slane %v1044_v13, 2 }
 0x8df   :  { %v1914_v9 = vpop.eup %1913  ;;  %v1046_v14 = vadd.f32 %v1045_v2, %v1044_v13 }
 0x8e0   :  { %998 = vadd.xlane.f32.xlu1 %v1914_v9 }
 0x8e1   :  { %v1047_v15 = vrot.slane %v1046_v14, 1 }
 0x8e3   :  { %v1048_v16 = vadd.f32 %v1047_v15, %v1046_v14 }
 0x8e5   :  { %1877 = vpush %v1048_v16 }
 0x916   :  { %s1878_s8 = spop %1877 }
 0x917   :  { %v1050_v17 = vstv %s1878_s8 }
 0x918   :  { %1915 = vrsqrt.f32 %v1050_v17  ;;  %vm1053_vm6 = vcmp.eq.f32.partialorder %v1050_v17, inf  ;;  %v1056_v20 = vand.u32 2147483648, %v1050_v17  ;;  %vm1055_vm7 = vcmp.eq.f32.partialorder %v1050_v17, 0.0 }
 0x919   :  { %1917 = vpow2.f32 %v1152_v25 }
 0x922   :  { %v1916_v19 = vpop.eup %1915 }
 0x923   :  { %v1052_v21 = vmul.f32 %v1916_v19, %v1050_v17  ;;  %v1918_v31 = vpop.eup %1917 }
 0x924   :  { %v1018_v34 = vadd.f32 1.0, %v1918_v31 }
 0x925   :  { %v1054_v60 = vsel %vm1053_vm6, %v1050_v17, %v1052_v21 }
 0x926   :  { %v1057_v22 = vsel %vm1055_vm7, %v1056_v20, %v1054_v60 }
 0x927   :  { %1879 = vpush %v1057_v22 }
 0x965   :  { %v1086_v27 = vpop.xlane.xlu0 %1085 }
 0x966   :  { %vm1087_vm8 = vcmp.eq.f32.partialorder %v1084_v7, %v1086_v27 }
 0x967   :  { %v1088_v30 = vsel %vm1087_vm8, %v1083_v29, inf }
 0x968   :  { %1089 = vmin.xlane.f32.xlu0 %v1088_v30 }
 0x96d   :  { %v999_v33 = vpop.xlane.xlu1 %998 }
 0x96e   :  { %1919 = vlog2.f32 %v999_v33 }
 0x96f   :  { %1921 = vrcp.f32 %v1018_v34 }
 0x978   :  { %v1920_v35 = vpop.eup %1919 }
 0x979   :  { %v1001_v37 = vmul.f32 0.6931472, %v1920_v35  ;;  %v1922_v40 = vpop.eup %1921 }
 0x97b   :  { %v1002_v38 = vadd.f32 %v1001_v37, %v994_v62 }
 0x97d   :  { %v1013_v41 = vsub.f32 %v1002_v38, %v1012_v10 }
 0x97f   :  { %v1060_v42 = vmul.f32 %v1922_v40, %v1013_v41 }
 0x981   :  { %v1062_v0 = vsel %vm1061_vm9, %v1060_v42, 0.0 }
 0x982   :  { %1063 = vadd.xlane.f32.xlu1 %v1062_v0 }
 0x983   :  { %2000 = shalt.err (!%p1997_p0)
}
 0x984   :  { %s2001_s18 = scalar_lea.hbm %s2553_s10, 128 }
 0x985   :  { %p2002_p1 = scmp.ne.s32.totalorder %s2553_s10, %s2001_s18  ;;  %p2005_p2 = scmp.lt.u32.totalorder %s2001_s18, %s2553_s10 }
 0x987   :  { %p2007_p3 = pnand %p2005_p2, %p2002_p1 }
 0x989   :  { %2010 = shalt.err (!%p2007_p3)
}
 0x98a   :  { %1105 = dma.vmem_to_hbm [thread:$0]  %s1103_s30, 128, %s2553_s10, [#allocation4]   ;;  %v1092_v43 = vcvt.f32.s32 %v1086_v27 }
 0x98b   :  { %s2063_s1 = smov [#allocation11]  }
 0x98c   :  { %s1120_s24 = sshll.u32 %s2063_s1, 4  ;;  %v1093_v59 = vshll.u32 %v1092_v43, 16  ;;  %s1121_s24 = int_to_ptr.vmem [resolvable:$true] %s1120_s24 }
 0x98d   :  { %s2011_s25 = scalar_lea.vmem %s1121_s24, 128  ;;  %p2016_p5 = scmp.lt.s32.totalorder %s1121_s24, %s1121_s24 }
 0x98e   :  { %p2012_p4 = scmp.ne.s32.totalorder %s1121_s24, %s2011_s25  ;;  %p2017_p6 = scmp.lt.s32.totalorder %s2011_s25, %s2011_s25 }
 0x990   :  { %p2018_p7 = por %p2017_p6, %p2016_p5 }
 0x992   :  { %p2019_p8 = pnand %p2018_p7, %p2012_p4 }
 0x9f5   :  { %v1090_v48 = vpop.xlane.xlu0 %1089 }
 0x9f6   :  { %v1091_v44 = vcvt.f32.s32 %v1090_v48 }
 0x9f8   :  { %v1094_v45 = vadd.s32 %v1093_v59, %v1091_v44 }
 0x9fa   :  { %1095 = vst [vmem:[#allocation11] sm:$0xff] %v1094_v45 }
 0x9fb   :  { %2022 = shalt.err (!%p2019_p8)
}
 0x9fc   :  { %s2023_s10 = scalar_lea.hbm %s2555_s12, 128 }
 0x9fd   :  { %p2024_p9 = scmp.ne.s32.totalorder %s2555_s12, %s2023_s10  ;;  %p2027_p10 = scmp.lt.u32.totalorder %s2023_s10, %s2555_s12 }
 0x9ff   :  { %p2029_p11 = pnand %p2027_p10, %p2024_p9 }
 0xa01   :  { %2032 = shalt.err (!%p2029_p11)
}
 0xa02   :  { %1123 = dma.vmem_to_hbm [thread:$0]  %s1121_s24, 128, %s2555_s12, [#allocation12]  }
 0xa03   :  { %s1880_s2 = spop %1879  ;;  %s2033_s13 = scalar_lea.hbm %s2554_s11, 16 }
 0xa04   :  { %s1059_s7 = smul.f32 0.0001, %s1880_s2  ;;  %p2034_p12 = scmp.ne.s32.totalorder %s2554_s11, %s2033_s13 }
 0xa05   :  { %p2037_p13 = scmp.lt.u32.totalorder %s2033_s13, %s2554_s11 }
 0xa07   :  { %p2039_p0 = pnand %p2037_p13, %p2034_p12 }
 0xa0f   :  { %v1064_v46 = vpop.xlane.xlu1 %1063 }
 0xa10   :  { %v1065_v53 = vrot.slane %v1064_v46, 4 }
 0xa12   :  { %v1066_v47 = vadd.f32 %v1065_v53, %v1064_v46 }
 0xa14   :  { %v1067_v49 = vrot.slane %v1066_v47, 2 }
 0xa16   :  { %v1068_v50 = vadd.f32 %v1067_v49, %v1066_v47 }
 0xa18   :  { %v1069_v6 = vrot.slane %v1068_v50, 1 }
 0xa1a   :  { %v1070_v8 = vadd.f32 %v1069_v6, %v1068_v50 }
 0xa1c   :  { %1881 = vpush %v1070_v8 }
 0xa4d   :  { %s1882_s8 = spop %1881 }
 0xa4e   :  { %s1074_s22 = smul.f32 0.125, %s1882_s8 }
 0xa50   :  { %s1075_s29 = sadd.f32 %s1074_s22, %s1059_s7 }
 0xa52   :  { %1077 = sst [smem:[#allocation10]] %s1075_s29 }
 0xa53   :  { %2042 = shalt.err (!%p2039_p0)
}
 0xa54   :  { %s2064_s19 = smov [#allocation10]  }
 0xa55   :  { %1113 = dma.smem_to_hbm %s2064_s19, 16, %s2554_s11, [#allocation5]  }
 0xa56   :  { %2047 = dma.done.wait [#allocation4], 128  }
 0xa57   :  { %2048 = vsyncadd [#allocation4], 4294967168 }
 0xa58   :  { %2049 = dma.done.wait [#allocation5], 16  }
 0xa59   :  { %2050 = vsyncadd [#allocation5], 4294967280 }
 0xa5a   :  { %2051 = dma.done.wait [#allocation12], 128  }
 0xa5b   :  { %2052 = vsyncadd [#allocation12], 4294967168 }
 0xa5c   :  { %1133 = sfence }
 0xa5d   :  { %1134 = vsyncpa [#allocation3], 1 }
 0xa5e   :  { %1135 = vsyncpa [#allocation7], 1 }
 0xa5f   :  { %1136 = vsyncpa [#allocation4], 1 }
 0xa60   :  { %1137 = vsyncpa [#allocation12], 1 }
 0xa61   :  { %1138 = vsyncpa [#allocation5], 1 }

</bundles_post_ra>
